<compile_context>
chip_gen: v7x
topology: tpu7x:2x2x1
jax: 0.10.0
libtpu: 0.0.40
codegen_flags: <defaults>
</compile_context>

<pallas_src>
import math
import functools

import numpy as np
import jax
import jax.numpy as jnp
from jax import lax
from jax.experimental import pallas as pl
from jax.experimental.pallas import tpu as pltpu


# ---------------------------------------------------------------------------
# Cached constants
# ---------------------------------------------------------------------------
@functools.lru_cache(maxsize=None)
def _dft_consts(L, C, dtype):
    """Stacked forward rFFT matrix (compute dtype) and Hermitian-folded inverse (f32)."""
    fh = L // 2 + 1
    fh_pad = max(8, ((fh + 7) // 8) * 8)
    t = np.arange(L, dtype=np.float64)
    f = np.arange(fh_pad, dtype=np.float64)
    ang = (2.0 * np.pi / L) * np.outer(f, t)                  # (fh_pad, L)
    valid = (np.arange(fh_pad) < fh).astype(np.float64)[:, None]
    cos_f = np.cos(ang) * valid
    sin_f = np.sin(ang) * valid
    w_fwd = np.concatenate([cos_f, sin_f], axis=0)            # (2*fh_pad, L)
    # Hermitian multiplicity (2 for non-DC/non-Nyquist bins) + 1/(L*C) mean folded in.
    m = np.full((fh_pad, 1), 2.0)
    m[0, 0] = 1.0
    if L % 2 == 0:
        m[L // 2, 0] = 1.0
    scale = 1.0 / (float(L) * float(C))
    w_inv = np.concatenate([cos_f * m, -(sin_f * m)], axis=0) * scale   # (2*fh_pad, L)
    return (jnp.asarray(w_fwd, dtype=dtype),
            jnp.asarray(w_inv, dtype=jnp.float32),
            fh_pad)


@functools.lru_cache(maxsize=None)
def _delay_diff(L):
    """diff[t, s] = (s - t) mod L  (resident shift-selection matrix for kernel 2)."""
    t = np.arange(L)
    return jnp.asarray((t[None, :] - t[:, None]) % L, dtype=jnp.int32)


def _divisor_tile(n, cap, step):
    """Largest multiple-of-`step` divisor of n that is <= cap, else n (full dim)."""
    if n <= cap:
        return n
    t = (cap // step) * step
    while t >= step:
        if n % t == 0:
            return t
        t -= step
    return n


# ---------------------------------------------------------------------------
# Kernel 1: mean (over heads & channels) of the circular cross-correlation.
# q/k blocks are (1, L, Cc) in the caller's dtype; output row (1, 1, L) f32 is kept
# resident and accumulated across the channel-chunk grid axis.
# ---------------------------------------------------------------------------
def _mean_corr_kernel(q_ref, k_ref, wf_ref, wi_ref, out_ref, *, fh_pad):
    c = pl.program_id(1)

    @pl.when(c == 0)
    def _():
        out_ref[...] = jnp.zeros_like(out_ref)

    qn = q_ref[0]                    # (L, Cc)  native time-major, caller dtype
    kn = k_ref[0]                    # (L, Cc)
    wf = wf_ref[...]                 # (2*Fp, L) stacked [cos ; sin] rFFT rows

    # Fused forward rFFT: ONE MXU matmul per operand, f32 accumulation.
    qcs = jnp.dot(wf, qn, preferred_element_type=jnp.float32)   # (2*Fp, Cc)
    kcs = jnp.dot(wf, kn, preferred_element_type=jnp.float32)
    qc, qs = qcs[:fh_pad], qcs[fh_pad:]
    kc, ks = kcs[:fh_pad], kcs[fh_pad:]

    # Spectral product  Q * conj(K), reduced over channels BEFORE the inverse (f32).
    pr = jnp.sum(qc * kc + qs * ks, axis=1, keepdims=True)      # (Fp, 1)
    pi = jnp.sum(qc * ks - qs * kc, axis=1, keepdims=True)      # (Fp, 1)

    # Tiny inverse rFFT (multiplicity + 1/(L*C) folded into wi), lane-dense (1, L) row.
    wi = wi_ref[...]                                            # (2*Fp, L) f32
    mc = jnp.sum(pr * wi[:fh_pad] + pi * wi[fh_pad:], axis=0, keepdims=True)

    out_ref[...] = out_ref[...] + mc[None]                      # (1, 1, L)


def mean_corr_pallas(q_n, k_n, w_fwd, w_inv, fh_pad):
    B, L, C = q_n.shape
    cc = _divisor_tile(C, 512, 128)          # channel chunk (bounds VMEM on v7x)
    n_c = C // cc
    kernel = functools.partial(_mean_corr_kernel, fh_pad=fh_pad)
    out = pl.pallas_call(
        kernel,
        out_shape=jax.ShapeDtypeStruct((B, 1, L), jnp.float32),
        grid_spec=pltpu.PrefetchScalarGridSpec(
            num_scalar_prefetch=0,
            grid=(B, n_c),
            in_specs=[pl.BlockSpec((1, L, cc), lambda b, c: (b, 0, c)),
                      pl.BlockSpec((1, L, cc), lambda b, c: (b, 0, c)),
                      pl.BlockSpec((2 * fh_pad, L), lambda b, c: (0, 0)),   # resident
                      pl.BlockSpec((2 * fh_pad, L), lambda b, c: (0, 0))],  # resident
            out_specs=pl.BlockSpec((1, 1, L), lambda b, c: (b, 0, 0)),
        ),
        compiler_params=pltpu.CompilerParams(
            dimension_semantics=("parallel", "arbitrary"),
            vmem_limit_bytes=64 * 1024 * 1024),
    )(q_n, k_n, w_fwd, w_inv)
    return out[:, 0, :]                       # (B, L) f32


# ---------------------------------------------------------------------------
# Kernel 2: time-delay aggregation (training path).
#   delays_agg[t, c] = sum_i w[b, i] * v[(t + d_i) mod L, c]
# realised per row-block as a single MXU matmul  A @ V  where A is built from the
# resident diff matrix (no per-step iota/mod).  Output written in the final
# lane-dense (B, L, H*D) layout and the caller's dtype.
# ---------------------------------------------------------------------------
def _agg_kernel(idx_ref, w_ref, diff_ref, v_ref, out_ref, *, top_k):
    b = pl.program_id(0)
    vals = v_ref[0]                  # (L, C)  native time-major, caller dtype
    diff = diff_ref[...]             # (tL, L) int32, diff[t,s] = (s - t) % L

    # TODO(synk): for very small C = H*D a pltpu.roll-based accumulate would skip the
    # A materialization entirely, but dynamic-shift roll lowering is not guaranteed,
    # so the MXU matmul path is kept.
    A = jnp.zeros(diff.shape, jnp.float32)
    for i in range(top_k):
        d = idx_ref[i]               # scalar delay (SMEM)
        w = w_ref[b, i]              # scalar softmax weight (SMEM)
        A = A + jnp.where(diff == d, w, jnp.float32(0.0))

    out_ref[0] = jnp.dot(A.astype(vals.dtype), vals,
                         preferred_element_type=jnp.float32).astype(out_ref.dtype)


def agg_pallas(index, weights, v_n, diff, top_k):
    B, L, C = v_n.shape
    tl = _divisor_tile(L, 256, 8)            # row-block -> 2nd parallel axis (v7x TCs)
    n_l = L // tl
    kernel = functools.partial(_agg_kernel, top_k=top_k)
    return pl.pallas_call(
        kernel,
        out_shape=jax.ShapeDtypeStruct((B, L, C), v_n.dtype),
        grid_spec=pltpu.PrefetchScalarGridSpec(
            num_scalar_prefetch=0,
            grid=(B, n_l),
            in_specs=[pl.BlockSpec(memory_space=pltpu.MemorySpace.SMEM),   # delays (top_k,)
                      pl.BlockSpec(memory_space=pltpu.MemorySpace.SMEM),   # weights (B, top_k)
                      pl.BlockSpec((tl, L), lambda b, j: (j, 0)),          # diff row-slice
                      pl.BlockSpec((1, L, C), lambda b, j: (b, 0, 0))],    # V (resident per b)
            out_specs=pl.BlockSpec((1, tl, C), lambda b, j: (b, j, 0)),
        ),
        compiler_params=pltpu.CompilerParams(
            dimension_semantics=("parallel", "parallel"),
            vmem_limit_bytes=64 * 1024 * 1024),
    )(index, weights, diff, v_n)


# ---------------------------------------------------------------------------
# Full forward (training-mode path of the PyTorch module; mask/dropout are never
# applied in the reference forward, output_attention=False -> corr not returned)
# ---------------------------------------------------------------------------
def auto_correlation_forward(queries, keys, values, factor=1):
    B, L, H, E = queries.shape
    _, S, _, D = values.shape
    if L > S:
        values = jnp.concatenate(
            [values, jnp.zeros((B, L - S, H, D), values.dtype)], axis=1)
        keys = jnp.concatenate(
            [keys, jnp.zeros((B, L - S, H, E), keys.dtype)], axis=1)
    else:
        values = values[:, :L]
        keys = keys[:, :L]

    # Native-layout channel merge (free reshape).  NO dtype cast: the kernels consume
    # the caller's dtype (bf16 in production) and accumulate in f32 on the MXU.
    q_n = queries.reshape(B, L, H * E)
    k_n = keys.reshape(B, L, H * E)
    v_n = values.reshape(B, L, H * D)

    w_fwd, w_inv, fh_pad = _dft_consts(L, H * E, queries.dtype)   # cached per (L,C,dtype)
    mean_value = mean_corr_pallas(q_n, k_n, w_fwd, w_inv, fh_pad)  # (B, L) f32

    # TODO(synk): batch-shared top-k + softmax over a length-L vector stays in plain
    # JAX glue (scalar-sized work, no benefit from a Pallas kernel).
    top_k = int(factor * math.log(L))
    _, index = lax.top_k(jnp.mean(mean_value, axis=0), top_k)     # (top_k,) shared delays
    weights = mean_value[:, index]                                 # (B, top_k) f32
    tmp_corr = jax.nn.softmax(weights, axis=-1)                    # (B, top_k) f32

    diff = _delay_diff(L)
    agg = agg_pallas(index.astype(jnp.int32), tmp_corr, v_n, diff, top_k)  # (B, L, H*D)
    V = agg.reshape(B, L, H, D)                                    # final torch layout
    return V, None                                                 # output_attention=False


# ---------------------------------------------------------------------------
# Pure-JAX reference (mirrors the PyTorch FFT-based training path, f32)
# ---------------------------------------------------------------------------
def reference_forward(queries, keys, values, factor=1):
    queries = queries.astype(jnp.float32)
    keys = keys.astype(jnp.float32)
    values = values.astype(jnp.float32)
    B, L, H, E = queries.shape
    _, S, _, D = values.shape
    if L > S:
        values = jnp.concatenate([values, jnp.zeros((B, L - S, H, D), jnp.float32)], 1)
        keys = jnp.concatenate([keys, jnp.zeros((B, L - S, H, E), jnp.float32)], 1)
    else:
        values = values[:, :L]
        keys = keys[:, :L]
    q_p = jnp.transpose(queries, (0, 2, 3, 1))
    k_p = jnp.transpose(keys, (0, 2, 3, 1))
    v_p = jnp.transpose(values, (0, 2, 3, 1))
    corr = jnp.fft.irfft(jnp.fft.rfft(q_p, axis=-1) * jnp.conj(jnp.fft.rfft(k_p, axis=-1)),
                         n=L, axis=-1)
    top_k = int(factor * math.log(L))
    mean_value = jnp.mean(jnp.mean(corr, axis=1), axis=1)          # (B, L)
    _, index = lax.top_k(jnp.mean(mean_value, axis=0), top_k)
    weights = mean_value[:, index]
    tmp_corr = jax.nn.softmax(weights, axis=-1)
    agg = jnp.zeros_like(v_p)
    for i in range(top_k):
        pattern = jnp.roll(v_p, -index[i], axis=-1)
        agg = agg + pattern * tmp_corr[:, i][:, None, None, None]
    return jnp.transpose(agg, (0, 3, 1, 2))


if __name__ == "__main__":
    key = jax.random.PRNGKey(0)
    B, L, S, H, E, D = 2, 16, 16, 4, 8, 8
    kq, kk, kv = jax.random.split(key, 3)

    # Periodic signal (period 8) + small noise -> top-k delay selection {0, 8} is well
    # separated from the rest, so bf16 rounding cannot flip the selected set.
    t = jnp.arange(L, dtype=jnp.float32)
    base = jnp.sin(2.0 * math.pi * t / 8.0)[None, :, None, None]
    queries = base + 0.1 * jax.random.normal(kq, (B, L, H, E), jnp.float32)
    keys_t = base + 0.1 * jax.random.normal(kk, (B, S, H, E), jnp.float32)
    values = base + 0.1 * jax.random.normal(kv, (B, S, H, D), jnp.float32)

    # --- f32 inputs: tight check against the FFT reference ---------------------------
    V32, attn = auto_correlation_forward(queries, keys_t, values, factor=1)
    V32 = jax.block_until_ready(V32)
    assert V32.shape == (B, L, H, D)
    assert attn is None
    V_ref = reference_forward(queries, keys_t, values, factor=1)
    assert jnp.allclose(V32, V_ref, atol=1e-4, rtol=1e-4), "f32 path mismatch vs FFT reference"

    # --- bf16 inputs (production MXU feed, f32 accumulation): loose check ------------
    qb = queries.astype(jnp.bfloat16)
    kb = keys_t.astype(jnp.bfloat16)
    vb = values.astype(jnp.bfloat16)
    Vb, _ = auto_correlation_forward(qb, kb, vb, factor=1)
    Vb = jax.block_until_ready(Vb)
    assert Vb.shape == (B, L, H, D)
    assert Vb.dtype == jnp.bfloat16
    V_ref_b = reference_forward(qb, kb, vb, factor=1)
    assert jnp.allclose(Vb.astype(jnp.float32), V_ref_b, atol=5e-2, rtol=5e-2), \
        "bf16 path mismatch vs FFT reference"

    print("KERNEL_OK")
</pallas_src>

<mosaic_0001>
module attributes {stable_mosaic.version = 11 : i64} {
  func.func @_mean_corr_kernel(%arg0: i32, %arg1: i32, %arg2: memref<1x16x32xf32, #tpu.memory_space<vmem>>, %arg3: memref<1x16x32xf32, #tpu.memory_space<vmem>>, %arg4: memref<32x16xf32, #tpu.memory_space<vmem>>, %arg5: memref<32x16xf32, #tpu.memory_space<vmem>>, %arg6: memref<1x1x16xf32, #tpu.memory_space<vmem>>) attributes {dimension_semantics = [#tpu.dimension_semantics<parallel>, #tpu.dimension_semantics<arbitrary>], iteration_bounds = array<i64: 2, 1>, scalar_prefetch = 0 : i64, scratch_operands = 0 : i64, tpu.core_type = #tpu.core_type<tc>, window_params = [{transform_indices = @transform_0, window_bounds = array<i64: 1, 16, 32>}, {transform_indices = @transform_1, window_bounds = array<i64: 1, 16, 32>}, {pipeline_mode = #tpu.pipeline_mode<synchronous>, transform_indices = @transform_2, window_bounds = array<i64: 32, 16>}, {pipeline_mode = #tpu.pipeline_mode<synchronous>, transform_indices = @transform_3, window_bounds = array<i64: 32, 16>}, {transform_indices = @transform_4, window_bounds = array<i64: 1, 1, 16>}]} {
    %c0_i32 = arith.constant 0 : i32
    %0 = arith.cmpi eq, %arg1, %c0_i32 : i32
    %1 = arith.extui %0 : i1 to i32
    %c0_i32_0 = arith.constant 0 : i32
    %2 = arith.cmpi ne, %1, %c0_i32_0 : i32
    scf.if %2 {
      %cst_20 = arith.constant 0.000000e+00 : f32
      %38 = vector.broadcast %cst_20 : f32 to vector<1x1x16xf32>
      %c0_21 = arith.constant 0 : index
      %c0_22 = arith.constant 0 : index
      %c0_23 = arith.constant 0 : index
      %39 = vector.load %arg6[%c0_21, %c0_22, %c0_23] : memref<1x1x16xf32, #tpu.memory_space<vmem>>, vector<1x1x16xf32>
      tpu.vector_store %arg6[%c0_21, %c0_22, %c0_23], %38 {strides = array<i32>} : memref<1x1x16xf32, #tpu.memory_space<vmem>>, vector<1x1x16xf32>,
    } else {
    }
    %c0 = arith.constant 0 : index
    %c0_1 = arith.constant 0 : index
    %c0_2 = arith.constant 0 : index
    %3 = vector.load %arg2[%c0, %c0_1, %c0_2] : memref<1x16x32xf32, #tpu.memory_space<vmem>>, vector<1x16x32xf32>
    %4 = vector.shape_cast %3 : vector<1x16x32xf32> to vector<16x32xf32>
    %c0_3 = arith.constant 0 : index
    %c0_4 = arith.constant 0 : index
    %c0_5 = arith.constant 0 : index
    %5 = vector.load %arg3[%c0_3, %c0_4, %c0_5] : memref<1x16x32xf32, #tpu.memory_space<vmem>>, vector<1x16x32xf32>
    %6 = vector.shape_cast %5 : vector<1x16x32xf32> to vector<16x32xf32>
    %c0_6 = arith.constant 0 : index
    %c0_7 = arith.constant 0 : index
    %7 = vector.load %arg4[%c0_6, %c0_7] : memref<32x16xf32, #tpu.memory_space<vmem>>, vector<32x16xf32>
    %cst = arith.constant dense<0.000000e+00> : vector<32x32xf32>
    %8 = tpu.matmul %7, %4, %cst {dimension_numbers = #tpu.dot_dimension_numbers<[1], [0], [0], [1], [0, 0, 1, 1], [], []>} : vector<32x16xf32>, vector<16x32xf32>, vector<32x32xf32> -> vector<32x32xf32>
    %cst_8 = arith.constant dense<0.000000e+00> : vector<32x32xf32>
    %9 = tpu.matmul %7, %6, %cst_8 {dimension_numbers = #tpu.dot_dimension_numbers<[1], [0], [0], [1], [0, 0, 1, 1], [], []>} : vector<32x16xf32>, vector<16x32xf32>, vector<32x32xf32> -> vector<32x32xf32>
    %10 = vector.extract_strided_slice %8 {offsets = [0, 0], sizes = [16, 32], strides = [1, 1]} : vector<32x32xf32> to vector<16x32xf32>
    %11 = vector.extract_strided_slice %8 {offsets = [16, 0], sizes = [16, 32], strides = [1, 1]} : vector<32x32xf32> to vector<16x32xf32>
    %12 = vector.extract_strided_slice %9 {offsets = [0, 0], sizes = [16, 32], strides = [1, 1]} : vector<32x32xf32> to vector<16x32xf32>
    %13 = vector.extract_strided_slice %9 {offsets = [16, 0], sizes = [16, 32], strides = [1, 1]} : vector<32x32xf32> to vector<16x32xf32>
    %14 = arith.mulf %10, %12 : vector<16x32xf32>
    %15 = arith.mulf %11, %13 : vector<16x32xf32>
    %16 = arith.addf %14, %15 : vector<16x32xf32>
    %cst_9 = arith.constant dense<0.000000e+00> : vector<16xf32>
    %17 = vector.multi_reduction <add>, %16, %cst_9 [1] : vector<16x32xf32> to vector<16xf32>
    %18 = vector.shape_cast %17 : vector<16xf32> to vector<16x1xf32>
    %19 = arith.mulf %10, %13 : vector<16x32xf32>
    %20 = arith.mulf %11, %12 : vector<16x32xf32>
    %21 = arith.subf %19, %20 : vector<16x32xf32>
    %cst_10 = arith.constant dense<0.000000e+00> : vector<16xf32>
    %22 = vector.multi_reduction <add>, %21, %cst_10 [1] : vector<16x32xf32> to vector<16xf32>
    %23 = vector.shape_cast %22 : vector<16xf32> to vector<16x1xf32>
    %c0_11 = arith.constant 0 : index
    %c0_12 = arith.constant 0 : index
    %24 = vector.load %arg5[%c0_11, %c0_12] : memref<32x16xf32, #tpu.memory_space<vmem>>, vector<32x16xf32>
    %25 = vector.extract_strided_slice %24 {offsets = [0, 0], sizes = [16, 16], strides = [1, 1]} : vector<32x16xf32> to vector<16x16xf32>
    %26 = vector.broadcast %18 : vector<16x1xf32> to vector<16x16xf32>
    %27 = arith.mulf %26, %25 : vector<16x16xf32>
    %28 = vector.extract_strided_slice %24 {offsets = [16, 0], sizes = [16, 16], strides = [1, 1]} : vector<32x16xf32> to vector<16x16xf32>
    %29 = vector.broadcast %23 : vector<16x1xf32> to vector<16x16xf32>
    %30 = arith.mulf %29, %28 : vector<16x16xf32>
    %31 = arith.addf %27, %30 : vector<16x16xf32>
    %cst_13 = arith.constant dense<0.000000e+00> : vector<16xf32>
    %32 = vector.multi_reduction <add>, %31, %cst_13 [0] : vector<16x16xf32> to vector<16xf32>
    %33 = vector.shape_cast %32 : vector<16xf32> to vector<1x16xf32>
    %c0_14 = arith.constant 0 : index
    %c0_15 = arith.constant 0 : index
    %c0_16 = arith.constant 0 : index
    %34 = vector.load %arg6[%c0_14, %c0_15, %c0_16] : memref<1x1x16xf32, #tpu.memory_space<vmem>>, vector<1x1x16xf32>
    %35 = vector.shape_cast %33 : vector<1x16xf32> to vector<1x1x16xf32>
    %36 = arith.addf %34, %35 : vector<1x1x16xf32>
    %c0_17 = arith.constant 0 : index
    %c0_18 = arith.constant 0 : index
    %c0_19 = arith.constant 0 : index
    %37 = vector.load %arg6[%c0_17, %c0_18, %c0_19] : memref<1x1x16xf32, #tpu.memory_space<vmem>>, vector<1x1x16xf32>
    tpu.vector_store %arg6[%c0_17, %c0_18, %c0_19], %36 {strides = array<i32>} : memref<1x1x16xf32, #tpu.memory_space<vmem>>, vector<1x1x16xf32>,
    return
  }
  func.func @transform_0(%arg0: i32, %arg1: i32) -> (i32, i32, i32) {
    %c0_i32 = arith.constant 0 : i32
    %c0_i32_0 = arith.constant 0 : i32
    return %arg0, %c0_i32, %arg1 : i32, i32, i32
  }
  func.func @transform_1(%arg0: i32, %arg1: i32) -> (i32, i32, i32) {
    %c0_i32 = arith.constant 0 : i32
    %c0_i32_0 = arith.constant 0 : i32
    return %arg0, %c0_i32, %arg1 : i32, i32, i32
  }
  func.func @transform_2(%arg0: i32, %arg1: i32) -> (i32, i32) {
    %c0_i32 = arith.constant 0 : i32
    %c0_i32_0 = arith.constant 0 : i32
    %c0_i32_1 = arith.constant 0 : i32
    return %c0_i32, %c0_i32_0 : i32, i32
  }
  func.func @transform_3(%arg0: i32, %arg1: i32) -> (i32, i32) {
    %c0_i32 = arith.constant 0 : i32
    %c0_i32_0 = arith.constant 0 : i32
    %c0_i32_1 = arith.constant 0 : i32
    return %c0_i32, %c0_i32_0 : i32, i32
  }
  func.func @transform_4(%arg0: i32, %arg1: i32) -> (i32, i32, i32) {
    %c0_i32 = arith.constant 0 : i32
    %c0_i32_0 = arith.constant 0 : i32
    %c0_i32_1 = arith.constant 0 : i32
    return %arg0, %c0_i32, %c0_i32_0 : i32, i32, i32
  }
}

</mosaic_0001>

<bundles_post_ra>
// kernel: tpu_custom_call.1
= control target key start
LH: loop header
LB: loop body
LE: loop exit
PB: predicated region body
PF: predicated region fallthrough
CT: control target
= control target key end

     0   :  { %s1413_s0 = inlined_call_operand.hbm [shape: f32[2,16,32], index: 0, kind: input, shape index: {}]   ;;  %s1414_s1 = inlined_call_operand.hbm [shape: f32[2,16,32], index: 1, kind: input, shape index: {}]   ;;  %s1415_s2 = inlined_call_operand.hbm [shape: f32[32,16], index: 2, kind: input, shape index: {}]   ;;  %s1416_s3 = inlined_call_operand.hbm [shape: f32[32,16], index: 3, kind: input, shape index: {}]   ;;  %s1417_s4 = inlined_call_operand.hbm [shape: f32[2,1,16], index: 4, kind: output, shape index: {}]  }
   0x1   :  { %1427 = sst [smem:[#allocation18_spill]] %s1413_s0 }
   0x2   :  { %1428 = sst [smem:[#allocation19_spill]] %s1415_s2 }
   0x3   :  { %1429 = sst [smem:[#allocation20_spill]] %s1416_s3 }
   0x4   :  { %9 = vsyncpa [#allocation3], 0 }
   0x5   :  { %11 = vsyncpa [#allocation3 + $0x1], 0 }
   0x6   :  { %12 = vsyncpa [#allocation6], 0 }
   0x7   :  { %14 = vsyncpa [#allocation6 + $0x1], 0 }
   0x8   :  { %15 = vsyncpa [#allocation9], 0 }
   0x9   :  { %16 = vsyncpa [#allocation4], 0 }
   0xa   :  { %18 = vsyncpa [#allocation4 + $0x1], 0  ;;  %s1086_s15 = smov 0   ;;  %s1088_s16 = smov 0  }
   0xb   :  { %s1090_s17 = smov 0   ;;  %s1092_s18 = smov 0  }
   0xc   :  { %s1094_s19 = smov 0   ;;  %s1096_s20 = smov 0  }
   0xd LB: > { %1430 = sst [smem:[#allocation16_spill]] %s1047_s19  ;;  %s1117_s21 = sadd.s32 4294967295, %s1051_s20   ;;  %s1051_s20 = sphi %s1096_s20, %s24_s20   ;;  %s1047_s19 = sphi %s1094_s19, %s1453_s19   ;;  %s1043_s18 = sphi %s1092_s18, %s1452_s18   ;;  %s1039_s17 = sphi %s1090_s17, %s1456_s17   ;;  %s1035_s16 = sphi %s1088_s16, %s1455_s16   ;;  %s1031_s15 = sphi %s1086_s15, %s1454_s15  }
   0xe   : > { %s681_s22 = sadd.s32 4294967294, %s1051_s20   ;;  %p58_p0 = scmp.ne.s32.totalorder %s1035_s16, %s1031_s15 }
   0xf   : > { %p1418_p1 = scmp.eq.s32.totalorder %s1117_s21, 0  ;;  %p158_p3 = scmp.eq.s32.totalorder %s681_s22, 1 }
  0x10   : > { %p682_p5 = scmp.ge.s32.totalorder %s1051_s20, 1  ;;  %p165_p7 = scmp.lt.s32.totalorder %s1051_s20, 3 }
  0x11   : > { %p1126_p4 = por %p1418_p1, %p58_p0  ;;  %p1131_p6 = por %p158_p3, %p58_p0 }
  0x12   : > { %p1136_p8 = pnand %p682_p5, %p165_p7  ;;  %s1053_s26 = smov [#allocation7]  }
  0x13   : > { %s1431_s23 = scalar_select %p1126_p4, 1, 0 }
  0x14   : > { %s1432_s24 = scalar_select %p1131_p6, 1, 0 }
  0x15   : > { %s177_s27 = sshll.u32 %s1053_s26, 4  ;;  %p764_p9 = pneg %p1136_p8  ;;  %s1140_s27 = int_to_ptr.vmem [resolvable:$true] %s177_s27 }
  0x16   : > { %s1054_s29 = smov [#allocation8]   ;;  %s1435_s2 = sld [smem:[#allocation19_spill]] }
  0x17   : > { %p1147_p11 = pnand %p764_p9, %p1418_p1  ;;  %s190_s30 = sshll.u32 %s1054_s29, 4  ;;  %s1151_s30 = int_to_ptr.vmem [resolvable:$true] %s190_s30 }
  0x19   : > { %p843_p13 = pneg %p1147_p11 }
  0x1c   : > { %s841_s7 = scalar_lea.hbm %s1435_s2, 512 }
  0x1d   : > { %p842_p12 = scmp.ne.s32.totalorder %s1435_s2, %s841_s7  ;;  %p848_p5 = scmp.lt.u32.totalorder %s841_s7, %s1435_s2 }
  0x1f   : > { %p844_p0 = pnand %p843_p13, %p842_p12 }
  0x21   : > { %p845_p3 = pneg %p844_p0 }
  0x23   : > { %p850_p7 = pnand %p848_p5, %p845_p3 }
  0x25   : > { %853 = shalt.err (!%p850_p7)
}
  0x26   : > { %s854_s12 = scalar_lea.vmem %s1140_s27, 512  ;;  %p862_p2 = scmp.lt.s32.totalorder %s1140_s27, %s1140_s27 }
  0x27   : > { %p855_p9 = scmp.ne.s32.totalorder %s1140_s27, %s854_s12  ;;  %p863_p12 = scmp.lt.s32.totalorder %s854_s12, %s854_s12 }
  0x29   : > { %p857_p10 = pnand %p855_p9, %p843_p13  ;;  %p864_p0 = por %p863_p12, %p862_p2 }
  0x2b   : > { %p858_p1 = pneg %p857_p10 }
  0x2d   : > { %p865_p6 = pnand %p864_p0, %p858_p1 }
  0x2f   : > { %868 = shalt.err (!%p865_p6)
}
  0x30   : > { %s1419_s13 = smov 128   ;;  %s1421_s14 = smov 8  }
  0x31   : > { %767 = dma.hbm_to_vmem [thread:$0]  (!%p1147_p11), %s1435_s2, 512, %s1140_s27, [#allocation6], %s1419_s13, %s1419_s13, %s1421_s14  }
  0x32   : > { %s1436_s3 = sld [smem:[#allocation20_spill]] }
  0x38   : > { %s869_s6 = scalar_lea.hbm %s1436_s3, 512 }
  0x39   : > { %p870_p1 = scmp.ne.s32.totalorder %s1436_s3, %s869_s6  ;;  %p876_p10 = scmp.lt.u32.totalorder %s869_s6, %s1436_s3 }
  0x3b   : > { %p872_p2 = pnand %p870_p1, %p843_p13 }
  0x3d   : > { %p873_p6 = pneg %p872_p2 }
  0x3f   : > { %p878_p3 = pnand %p876_p10, %p873_p6 }
  0x41   : > { %881 = shalt.err (!%p878_p3)
}
  0x42   : > { %s882_s27 = scalar_lea.vmem %s1151_s30, 512  ;;  %p890_p12 = scmp.lt.s32.totalorder %s1151_s30, %s1151_s30 }
  0x43   : > { %p883_p5 = scmp.ne.s32.totalorder %s1151_s30, %s882_s27  ;;  %p891_p0 = scmp.lt.s32.totalorder %s882_s27, %s882_s27 }
  0x45   : > { %p885_p7 = pnand %p883_p5, %p843_p13  ;;  %p892_p1 = por %p891_p0, %p890_p12 }
  0x47   : > { %p886_p9 = pneg %p885_p7 }
  0x49   : > { %p893_p2 = pnand %p892_p1, %p886_p9 }
  0x4b   : > { %896 = shalt.err (!%p893_p2)
}
  0x4c   : > { %770 = dma.hbm_to_vmem [thread:$0]  (!%p1147_p11), %s1436_s3, 512, %s1151_s30, [#allocation9], %s1419_s13, %s1419_s13, %s1421_s14  }
  0x4d   : > { %s36_s28 = sadd.s32 1, %s1047_s19  ;;  %s45_s22 = sadd.s32 1, %s1039_s17 }
  0x4e   : > { %p38_p13 = scmp.ge.s32.totalorder %s36_s28, 2  ;;  %p52_p6 = scmp.ne.s32.totalorder %s1039_s17, %s1035_s16 }
  0x4f   : > { %p53_p10 = scmp.eq.s32.totalorder %s1051_s20, 0  ;;  %p784_p3 = scmp.lt.s32.totalorder %s1051_s20, 2 }
  0x50   : > { %s1458_s28 = smov (%p38_p13, %s36_s28), 0  ;;  %p1438_p7 = scmp.eq.s32.totalorder %s1117_s21, 1 }
  0x51   : > { %1437 = sst [smem:[#allocation17_spill]] %s1458_s28  ;;  %p54_p5 = por %p53_p10, %p52_p6 }
  0x52   : > { %p1221_p9 = por %p1438_p7, %p52_p6  ;;  %s40_s29 = ssub.s32 %s1047_s19, %s1458_s28 }
  0x53   : > { %s204_s5 = sand.u32 1, %s1039_s17   ;;  %p43_p12 = scmp.eq.s32.totalorder %s40_s29, 0 }
  0x54   : > { %s1439_s26 = scalar_select %p1221_p9, 1, 0 }
  0x55   : > { %s1228_s30 = sshll.u32 %s204_s5, 4  ;;  %s708_s6 = sshll.u32 %s1047_s19, 8 }
  0x56   : > { %s1232_s7 = scalar_select %p43_p12, %s1039_s17, %s45_s22  }
  0x57   : > { %s1440_s0 = sld [smem:[#allocation18_spill]]  ;;  %s208_s27 = scalar_lea.vmem [#allocation2], %s1228_s30 }
  0x58   : > { %s216_s11 = sshll.u32 %s208_s27, 4  ;;  %p1242_p11 = pnand %p784_p3, %p54_p5  ;;  %s1246_s11 = int_to_ptr.vmem [resolvable:$true] %s216_s11 }
  0x59   : > { %s1251_s8 = scalar_lea.hbm %s1414_s1, %s708_s6  ;;  %s1253_s9 = scalar_lea.sflag [#allocation3], %s204_s5 }
  0x5a   : > { %p899_p1 = pneg %p1242_p11 }
  0x5d   : > { %s1237_s10 = scalar_lea.hbm %s1440_s0, %s708_s6  ;;  %s902_s2 = scalar_lea.hbm %s1440_s0, 512 }
  0x5e   : > { %s897_s13 = scalar_lea.hbm %s1237_s10, 256  ;;  %p903_p6 = scmp.lt.u32.totalorder %s1237_s10, %s1440_s0 }
  0x5f   : > { %p898_p0 = scmp.ne.s32.totalorder %s1237_s10, %s897_s13  ;;  %p904_p10 = scmp.lt.u32.totalorder %s902_s2, %s897_s13 }
  0x60   : > { %p906_p5 = scmp.lt.u32.totalorder %s897_s13, %s1237_s10 }
  0x61   : > { %p900_p2 = pnand %p899_p1, %p898_p0  ;;  %p905_p3 = por %p904_p10, %p903_p6 }
  0x63   : > { %p901_p13 = pneg %p900_p2  ;;  %p907_p7 = por %p906_p5, %p905_p3 }
  0x65   : > { %p908_p12 = pnand %p907_p7, %p901_p13 }
  0x67   : > { %911 = shalt.err (!%p908_p12)
}
  0x68   : > { %s912_s5 = scalar_lea.vmem %s1246_s11, 256  ;;  %s1057_s14 = smov [#allocation2]  }
  0x69   : > { %p913_p0 = scmp.ne.s32.totalorder %s1246_s11, %s912_s5  ;;  %s917_s6 = sshll.u32 %s1057_s14, 4  ;;  %s918_s6 = int_to_ptr.vmem [resolvable:$false] %s917_s6 }
  0x6a   : > { %s919_s3 = scalar_lea.vmem %s918_s6, 512  ;;  %p920_p4 = scmp.lt.s32.totalorder %s1246_s11, %s918_s6 }
  0x6b   : > { %p915_p2 = pnand %p913_p0, %p899_p1  ;;  %p921_p6 = scmp.lt.s32.totalorder %s919_s3, %s912_s5 }
  0x6d   : > { %p916_p9 = pneg %p915_p2  ;;  %p922_p10 = por %p921_p6, %p920_p4 }
  0x6f   : > { %p923_p3 = pnand %p922_p10, %p916_p9 }
  0x71   : > { %926 = shalt.err (!%p923_p3)
}
  0x72   : > { %s1442_s2 = smov 8   ;;  %s1443_s13 = smov 128  }
  0x73   : > { %774 = dma.hbm_to_vmem [thread:$0]  (!%p1242_p11), %s1237_s10, 256, %s1246_s11, %s1253_s9, %s1443_s13, %s1443_s13, %s1442_s2  }
  0x74   : > { %s230_s28 = scalar_lea.vmem [#allocation5], %s1228_s30  ;;  %s226_s29 = sand.u32 1, %s1051_s20  }
  0x75   : > { %s238_s22 = sshll.u32 %s230_s28, 4  ;;  %s1288_s27 = scalar_lea.sflag [#allocation6], %s226_s29  ;;  %s1286_s22 = int_to_ptr.vmem [resolvable:$true] %s238_s22 }
  0x76   : > { %s927_s5 = scalar_lea.hbm %s1251_s8, 256  ;;  %s932_s3 = scalar_lea.hbm %s1414_s1, 512 }
  0x77   : > { %p928_p4 = scmp.ne.s32.totalorder %s1251_s8, %s927_s5  ;;  %p933_p5 = scmp.lt.u32.totalorder %s1251_s8, %s1414_s1 }
  0x78   : > { %p934_p7 = scmp.lt.u32.totalorder %s932_s3, %s927_s5  ;;  %p936_p0 = scmp.lt.u32.totalorder %s927_s5, %s1251_s8 }
  0x79   : > { %p930_p9 = pnand %p928_p4, %p899_p1 }
  0x7a   : > { %p935_p12 = por %p934_p7, %p933_p5 }
  0x7b   : > { %p931_p13 = pneg %p930_p9 }
  0x7c   : > { %p937_p2 = por %p936_p0, %p935_p12 }
  0x7e   : > { %p938_p6 = pnand %p937_p2, %p931_p13 }
  0x80   : > { %941 = shalt.err (!%p938_p6)
}
  0x81   : > { %s942_s30 = scalar_lea.vmem %s1286_s22, 256  ;;  %s1058_s10 = smov [#allocation5]  }
  0x82   : > { %p943_p10 = scmp.ne.s32.totalorder %s1286_s22, %s942_s30  ;;  %s947_s11 = sshll.u32 %s1058_s10, 4  ;;  %s948_s11 = int_to_ptr.vmem [resolvable:$false] %s947_s11 }
  0x83   : > { %s949_s0 = scalar_lea.vmem %s948_s11, 512  ;;  %p950_p9 = scmp.lt.s32.totalorder %s1286_s22, %s948_s11 }
  0x84   : > { %p945_p3 = pnand %p943_p10, %p899_p1  ;;  %p951_p5 = scmp.lt.s32.totalorder %s949_s0, %s942_s30 }
  0x86   : > { %p946_p4 = pneg %p945_p3  ;;  %p952_p7 = por %p951_p5, %p950_p9 }
  0x88   : > { %p953_p12 = pnand %p952_p7, %p946_p4 }
  0x8a   : > { %956 = shalt.err (!%p953_p12)
}
  0x8b   : > { %777 = dma.hbm_to_vmem [thread:$0]  (!%p1242_p11), %s1251_s8, 256, %s1286_s22, %s1288_s27, %s1443_s13, %s1443_s13, %s1442_s2  }
  0x8c   : > { %250 = sbr.rel (%p1136_p8) target bundleno = 568 (0x238), region = 36  ;;  %s1320_s19 = sand.u32 (!%p1136_p8), 1, %s1035_s16  }
  0x8d   : > { %s693_s9 = sshll.u32 (!%p1136_p8), %s1320_s19, 4  ;;  %s253_s28 = scalar_lea.sflag (!%p1136_p8), [#allocation3], %s1320_s19 }
  0x8e   : > { %s256_s29 = scalar_lea.vmem (!%p1136_p8), [#allocation2], %s693_s9  ;;  %p1444_p1 = scmp.ne.s32.totalorder (!%p1136_p8), %s1431_s23, 0 }
  0x93   : > { %1010 = dma.done.wait (%p1444_p1), %s253_s28, 256  }
  0x94   : > { %1012 = vsyncadd (%p1444_p1), %s253_s28, 4294967040  ;;  %s261_s12 = sand.u32 1, %s1117_s21   ;;  %s265_s25 = scalar_lea.vmem [#allocation5], %s693_s9 }
  0x95   : > { %s262_s8 = scalar_lea.sflag [#allocation6], %s261_s12 }
  0x96   : > { %1014 = dma.done.wait (%p1444_p1), %s262_s8, 256  }
  0x97   : > { %1016 = vsyncadd (%p1444_p1), %s262_s8, 4294967040  ;;  %p1445_p8 = scmp.eq.s32.totalorder %s1117_s21, 0 }
  0x99   : > { %1018 = dma.done.wait (%p1445_p8), [#allocation6], 512   ;;  %p1446_p11 = pmov %p1445_p8 }
  0x9a   : > { %p1447_p13 = pmov %p1445_p8 }
  0x9b   : > { %1020 = vsyncadd (%p1446_p11), [#allocation6], 4294966784 }
  0x9c   : > { %1022 = dma.done.wait (%p1447_p13), [#allocation9], 512   ;;  %p1448_p0 = pmov %p1445_p8 }
  0x9d   : > { %vm316_vm0 = vcmask 130048   ;;  %v308_v0 = vld [vmem:[%s256_s29] sm:$0xff]  ;;  %v309_v1 = vld [vmem:[%s256_s29 + $0x8] sm:$0xff]  ;;  %vm505_vm1 = vcmask 261120   ;;  %vm306_vm2 = vcmask 122880   ;;  %s1350_s21 = scalar_lea.vmem [#allocation10], %s1320_s19 }
  0x9e   : > { %1024 = vsyncadd (%p1448_p0), [#allocation9], 4294966784  ;;  %v310_v2 = vld [vmem:[%s265_s25] sm:$0xff]  ;;  %v742_v3 = vpack.c.bf16 %v309_v1, %v308_v0  ;;  %v311_v4 = vld [vmem:[%s265_s25 + $0x8] sm:$0xff]  ;;  %v1059_v34 = vmov 0.0   ;;  %s705_s23 = sshll.u32 %s1043_s18, 4 }
  0x9f   : > { %v312_v5 = vld [vmem:[#allocation7] sm:$0xff]  ;;  %v746_v6 = vpack.c.bf16 %v311_v4, %v310_v2  ;;  %v313_v7 = vld [vmem:[#allocation7 + $0x8] sm:$0xff]  ;;  %v314_v8 = vld [vmem:[#allocation7 + $0x10] sm:$0xff]  ;;  %307 = vst.msk [vmem:[%s1350_s21] sm:$0x1] %vm306_vm2, %v1059_v34  ;;  %s560_s2 = sshll.u32 %s1350_s21, 4  ;;  %s1362_s27 = scalar_lea.hbm %s1417_s4, %s705_s23  ;;  %s1364_s2 = int_to_ptr.vmem [resolvable:$true] %s560_s2 }
  0xa0   : > { %726 = vmatprep.mubr.msk.f32.mxu0 %vm316_vm0, %v312_v5  ;;  %736 = vmatprep.mubr.msk.f32.mxu1 %vm316_vm0, %v312_v5  ;;  %v315_v9 = vld [vmem:[#allocation7 + $0x18] sm:$0xff]  ;;  %v526_v35 = vld [vmem:[#allocation8 + $0x10] sm:$0xff]  ;;  %v524_v36 = vld [vmem:[#allocation8] sm:$0xff]  ;;  %s548_s5 = scalar_lea.sflag [#allocation4], %s1320_s19  ;;  %s957_s14 = scalar_lea.vmem %s1364_s2, 16 }
  0xa1   : > { %743 = vmatprep.subr.bf16.mxu0 %v742_v3  ;;  %747 = vmatprep.subr.bf16.mxu1 %v746_v6  ;;  %v527_v41 = vld [vmem:[#allocation8 + $0x18] sm:$0xff]  ;;  %v525_v42 = vld [vmem:[#allocation8 + $0x8] sm:$0xff]  ;;  %p958_p2 = scmp.ne.s32.totalorder %s1364_s2, %s957_s14  ;;  %p1449_p6 = scmp.ne.s32.totalorder %s1439_s26, 0 }
  0xa2   : > { %745 = vmatpush3.bf16.msra.mxu0 %v742_v3  ;;  %749 = vmatpush3.bf16.msra.mxu1 %v746_v6  ;;  %s1060_s18 = smov [#allocation10]  }
  0xa3   : > { %p959_p10 = pnand %p958_p2, %p1449_p6  ;;  %s961_s6 = sshll.u32 %s1060_s18, 4  ;;  %s962_s6 = int_to_ptr.vmem [resolvable:$false] %s961_s6 }
  0xa4   : > { %s963_s3 = scalar_lea.vmem %s962_s6, 32  ;;  %p964_p4 = scmp.lt.s32.totalorder %s1364_s2, %s962_s6 }
  0xa5   : > { %727 = vmatmul.mubr.msk.f32.vlgmr.msra.gmra.mrb[0].mxu0 %vm316_vm0, %v313_v7  ;;  %737 = vmatmul.mubr.msk.f32.vlgmr.msra.gmra.mrb[0].mxu1 %vm316_vm0, %v313_v7  ;;  %p960_p3 = pneg %p959_p10  ;;  %p965_p9 = scmp.lt.s32.totalorder %s963_s3, %s957_s14 }
  0xa6   : > { %729 = vmatprep.mubr.msk.f32.mxu0 %vm316_vm0, %v314_v8  ;;  %739 = vmatprep.mubr.msk.f32.mxu1 %vm316_vm0, %v314_v8  ;;  %v543_v57 = vld [vmem:[%s1350_s21] sm:$0x1] }
  0xa7   : > { %p966_p5 = por %p965_p9, %p964_p4 }
  0xa9   : > { %730 = vmatmul.mubr.msk.f32.gmra.mrb[2].mxu0 %vm316_vm0, %v315_v9  ;;  %740 = vmatmul.mubr.msk.f32.gmra.mrb[2].mxu1 %vm316_vm0, %v315_v9  ;;  %p967_p7 = pnand %p966_p5, %p960_p3 }
 0x178   : > { %v728_v10 = vpop.f32.mrb[0].mxu0  ;;  %v738_v11 = vpop.f32.mrb[0].mxu1 }
 0x179   : > { %v395_v12 = vpop.f32.mrb[1].mxu0  ;;  %v500_v13 = vmul.f32 %v738_v11, %v728_v10  ;;  %v480_v14 = vpop.f32.mrb[1].mxu1 }
 0x17a   : > { %v499_v15 = vmul.f32 %v480_v14, %v395_v12 }
 0x17c   : > { %v731_v16 = vpop.f32.mrb[2].mxu0  ;;  %v741_v18 = vpop.f32.mrb[2].mxu1 }
 0x17d   : > { %v515_v17 = vmul.f32 %v738_v11, %v731_v16  ;;  %v405_v19 = vpop.f32.mrb[3].mxu0  ;;  %v502_v20 = vmul.f32 %v741_v18, %v731_v16  ;;  %v513_v21 = vmul.f32 %v741_v18, %v728_v10  ;;  %v490_v23 = vpop.f32.mrb[3].mxu1 }
 0x17e   : > { %v514_v22 = vmul.f32 %v480_v14, %v405_v19  ;;  %v501_v24 = vmul.f32 %v490_v23, %v405_v19  ;;  %v512_v25 = vmul.f32 %v490_v23, %v395_v12 }
 0x17f   : > { %v517_v26 = vsub.f32 %v513_v21, %v515_v17  ;;  %v504_v27 = vadd.f32 %v502_v20, %v500_v13 }
 0x180   : > { %v516_v28 = vsub.f32 %v512_v25, %v514_v22  ;;  %v503_v29 = vadd.f32 %v501_v24, %v499_v15 }
 0x181   : > { %v521_v32 = vsel %vm505_vm1, %v517_v26, 0.0  ;;  %v509_v33 = vsel %vm505_vm1, %v504_v27, 0.0 }
 0x182   : > { %v518_v30 = vsel %vm505_vm1, %v516_v28, 0.0  ;;  %v506_v31 = vsel %vm505_vm1, %v503_v29, 0.0 }
 0x183   : > { %519 = vadd.xlane.f32.xlu1 %v518_v30  ;;  %507 = vadd.xlane.f32.xlu0 %v506_v31 }
 0x187   : > { %522 = vadd.xlane.f32.xlu1 %v521_v32  ;;  %510 = vadd.xlane.f32.xlu0 %v509_v33 }
 0x210   : > { %v520_v37 = vpop.xlane.xlu1 %519  ;;  %v508_v38 = vpop.xlane.xlu0 %507 }
 0x211   : > { %v530_v39 = vmul.f32 %v526_v35, %v520_v37  ;;  %v528_v40 = vmul.f32 %v524_v36, %v508_v38 }
 0x213   : > { %v532_v45 = vadd.f32 %v530_v39, %v528_v40 }
 0x214   : > { %v523_v43 = vpop.xlane.xlu1 %522  ;;  %v511_v44 = vpop.xlane.xlu0 %510 }
 0x215   : > { %v531_v46 = vmul.f32 %v527_v41, %v523_v43  ;;  %v529_v47 = vmul.f32 %v525_v42, %v511_v44  ;;  %v534_v49 = vsel %vm316_vm0, %v532_v45, 0.0 }
 0x217   : > { %v533_v48 = vadd.f32 %v531_v46, %v529_v47 }
 0x219   : > { %v535_v50 = vsel %vm316_vm0, %v533_v48, 0.0 }
 0x21a   : > { %v536_v51 = vadd.f32 %v535_v50, %v534_v49 }
 0x21c   : > { %v537_v52 = vrot.slane %v536_v51, 4 }
 0x21e   : > { %v538_v53 = vadd.f32 %v537_v52, %v536_v51 }
 0x220   : > { %v539_v54 = vrot.slane %v538_v53, 2 }
 0x222   : > { %v540_v55 = vadd.f32 %v539_v54, %v538_v53 }
 0x224   : > { %v541_v56 = vrot.slane %v540_v55, 1 }
 0x226   : > { %v542_v58 = vadd.f32 %v541_v56, %v540_v55 }
 0x228   : > { %v544_v59 = vadd.f32 %v543_v57, %v542_v58 }
 0x22a   : > { %546 = vst.msk [vmem:[%s1350_s21] sm:$0x1] %vm306_vm2, %v544_v59 }
 0x22b   : > { %970 = shalt.err (!%p967_p7)
}
 0x22c   : > { %s971_s30 = scalar_lea.hbm %s1362_s27, 16  ;;  %s975_s0 = scalar_lea.hbm %s1417_s4, 32 }
 0x22d   : > { %p972_p12 = scmp.ne.s32.totalorder %s1362_s27, %s971_s30  ;;  %p976_p11 = scmp.lt.u32.totalorder %s1362_s27, %s1417_s4 }
 0x22e   : > { %p977_p13 = scmp.lt.u32.totalorder %s975_s0, %s971_s30  ;;  %p979_p2 = scmp.lt.u32.totalorder %s971_s30, %s1362_s27 }
 0x22f   : > { %p973_p1 = pnand %p972_p12, %p1449_p6 }
 0x230   : > { %p978_p0 = por %p977_p13, %p976_p11 }
 0x231   : > { %p974_p8 = pneg %p973_p1 }
 0x232   : > { %p980_p10 = por %p979_p2, %p978_p0 }
 0x234   : > { %p981_p3 = pnand %p980_p10, %p974_p8 }
 0x236   : > { %984 = shalt.err (!%p981_p3)
}
 0x237   : > { %762 = dma.vmem_to_hbm [thread:$0]  (%p1449_p6), %s1364_s2, 16, %s1362_s27, %s548_s5  }
 0x238 PF: > { %s572_s28 = sand.u32 1, %s1031_s15   ;;  %p1450_p4 = scmp.ne.s32.totalorder %s1432_s24, 0 }
 0x239   : > { %p1451_p9 = scmp.ge.s32.totalorder %s1051_s20, 2  ;;  %s573_s29 = scalar_lea.sflag [#allocation4], %s572_s28 }
 0x23b   : > { %p779_p5 = pnand %p1451_p9, %p1450_p4 }
 0x23d   : > { %1026 = dma.done.wait (!%p779_p5), %s573_s29, 16  }
 0x23e   : > { %1028 = vsyncadd (!%p779_p5), %s573_s29, 4294967280  ;;  %s24_s20 = sadd.s32 1, %s1051_s20   ;;  %s1452_s18 = sld [smem:[#allocation16_spill]] }
 0x23f   : > { %p21_p7 = scmp.ge.s32.totalorder %s24_s20, 4   ;;  %s1453_s19 = sld [smem:[#allocation17_spill]] }
 0x240   : > { %s1454_s15 = smov %s1035_s16  ;;  %s1455_s16 = smov %s1039_s17 }
 0x241   : > { %s1456_s17 = smov %s1232_s7  ;;  %23 = sbr.rel (!%p21_p7) target bundleno = 13 (0xd), region = 106 }
 0x248   :  { %577 = vsyncpa [#allocation3], 1 }
 0x249   :  { %579 = vsyncpa [#allocation3 + $0x1], 1 }
 0x24a   :  { %580 = vsyncpa [#allocation6], 1 }
 0x24b   :  { %582 = vsyncpa [#allocation6 + $0x1], 1 }
 0x24c   :  { %583 = vsyncpa [#allocation9], 1 }
 0x24d   :  { %584 = vsyncpa [#allocation4], 1 }
 0x24e   :  { %586 = vsyncpa [#allocation4 + $0x1], 1 }

</bundles_post_ra>
